<compile_context>
chip_gen: v5e
topology: v5e:2x2
jax: 0.10.0
libtpu: 0.0.40
codegen_flags: <defaults>
</compile_context>

<pallas_src>
import functools

import jax
import jax.numpy as jnp
from jax.experimental import pallas as pl
from jax.experimental.pallas import tpu as pltpu

_LANES = 128      # vreg lane width
_SUBLANES = 8     # vreg sublane count


def _round_up(a, b):
    return ((a + b - 1) // b) * b


# ------------------------------ pe table -------------------------------------
def make_pe_table(d_model, resolution=100):
    """Matches the torch buffer construction in FractionalEncoder.__init__."""
    half = d_model // 2
    x = jnp.arange(resolution, dtype=jnp.float32).reshape(resolution, 1)
    frac = jnp.arange(half, dtype=jnp.float32).reshape(1, half)
    frac = jnp.broadcast_to(frac, (resolution, half))
    pe = jnp.zeros((resolution, half), jnp.float32)
    pe = pe.at[:, 0::2].set(
        jnp.sin(x / jnp.power(50.0, 2.0 * frac[:, 0::2] / half)))
    pe = pe.at[:, 1::2].set(
        jnp.cos(x / jnp.power(50.0, 2.0 * frac[:, 1::2] / half)))
    return pe


def make_packed_pe(pe, pack, res_pad):
    """Zero-pad pe rows resolution -> res_pad (lane-aligned K) and build the
    block-diagonal table kron(I_pack, pe_pad) of shape (pack*res_pad, pack*half)."""
    resolution, half = pe.shape
    pe_pad = jnp.zeros((res_pad, half), pe.dtype).at[:resolution, :].set(pe)
    if pack == 1:
        return pe_pad
    return jnp.kron(jnp.eye(pack, dtype=pe.dtype), pe_pad)


# ------------------------------- kernel --------------------------------------
def _frac_enc_kernel(x_ref, pe_ref, o_ref, *, resolution, res_pad, pack, log10):
    # x_ref : (block_groups, pack)          f32 fractional amounts (pack per row)
    # pe_ref: (pack*res_pad, pack*half)     f32 block-diagonal table (VMEM-resident)
    # o_ref : (block_groups, pack*half)     f32 lane-dense packed output
    x = x_ref[...]
    if log10:
        x = 0.0025 * jnp.square(jnp.log2(x))
        x = jnp.minimum(x, 1.0)                      # clamp(max=1)
    x = jnp.maximum(x, 1.0 / resolution)             # clamp(min=1/resolution)
    idx = jnp.round(x * resolution).astype(jnp.int32) - 1
    idx = jnp.clip(idx, 0, resolution - 1)           # match gather clamping for x > 1

    bg = x_ref.shape[0]
    k_dim = pack * res_pad

    # Block-structured one-hot: for group g, slot p the "1" sits at global
    # column p*res_pad + idx[g, p].  Built with a small static loop of
    # lane-broadcast compares (VPU); no dynamic gather, no cross-lane shuffles.
    col = jax.lax.broadcasted_iota(jnp.int32, (bg, k_dim), 1)
    onehot = jnp.zeros((bg, k_dim), jnp.float32)
    for p in range(pack):                            # static, unrolled (pack <= 8)
        onehot = onehot + (col == idx[:, p:p + 1] + p * res_pad).astype(jnp.float32)

    # Gather pe[idx] for all pack slots as one lane-dense MXU matmul.
    # Keep full f32 so the gather stays exact.
    o_ref[...] = jnp.dot(onehot, pe_ref[...], preferred_element_type=jnp.float32)


# ------------------------------ wrapper --------------------------------------
def fractional_encoder_forward(x, pe, *, resolution=100, log10=False,
                               block_rows=2048):
    """out[..., :] = pe[round(clamp(x)*resolution) - 1]; out shape = x.shape + (half,)."""
    orig_shape = x.shape
    pe_res, half = pe.shape
    assert pe_res == resolution
    res_pad = _round_up(resolution, _LANES)          # lane-aligned contraction dim

    # Row-packing factor so one output row is a full 128-lane vreg row.
    if half < _LANES and _LANES % half == 0:
        pack = _LANES // half
    else:
        pack = 1                                     # half already lane-friendly

    n = int(x.size)
    x_flat = x.reshape(-1).astype(jnp.float32)

    # ------- always-tiled grid: >=2 steps, blocks a multiple of 8 groups -------
    groups = pl.cdiv(n, pack)
    block_groups = max(_SUBLANES, (block_rows // pack) // _SUBLANES * _SUBLANES)
    # shrink blocks for small inputs so we still get >=2 pipelined /
    # megacore-shardable grid steps without excessive padding
    block_groups = min(block_groups,
                       max(_SUBLANES, _round_up(pl.cdiv(groups, 2), _SUBLANES)))
    grid_steps = max(2, pl.cdiv(groups, block_groups))
    groups_padded = grid_steps * block_groups
    n_padded = groups_padded * pack

    # pad with 1.0 (a safe in-range fraction); padded rows are sliced off below
    x_pad = jnp.pad(x_flat, (0, n_padded - n), constant_values=1.0)
    x2 = x_pad.reshape(groups_padded, pack)

    pe_big = make_packed_pe(pe, pack, res_pad)       # (pack*res_pad, pack*half)

    # explicit scoped-VMEM budget: 2 buffers x (x + out block) + one-hot
    # temporaries + resident table + headroom
    xb = block_groups * pack * 4
    ob = block_groups * pack * half * 4
    oh = block_groups * pack * res_pad * 4
    vmem_bytes = 2 * (xb + ob) + 4 * oh + int(pe_big.size) * 4 + (2 << 20)
    vmem_bytes = min(max(int(vmem_bytes), 8 << 20), 32 << 20)

    kernel = functools.partial(_frac_enc_kernel, resolution=resolution,
                               res_pad=res_pad, pack=pack, log10=log10)
    out = pl.pallas_call(
        kernel,
        out_shape=jax.ShapeDtypeStruct((groups_padded, pack * half), jnp.float32),
        grid=(grid_steps,),
        in_specs=[
            pl.BlockSpec((block_groups, pack), lambda i: (i, 0)),
            pl.BlockSpec(pe_big.shape, lambda i: (0, 0)),   # table stays resident
        ],
        out_specs=pl.BlockSpec((block_groups, pack * half), lambda i: (i, 0)),
        compiler_params=pltpu.CompilerParams(
            dimension_semantics=("parallel",),
            vmem_limit_bytes=vmem_bytes),
    )(x2, pe_big)

    out = out.reshape(n_padded, half)[:n]
    return out.reshape(orig_shape + (half,))


# ------------------------------ reference ------------------------------------
def _reference(x, pe, *, resolution=100, log10=False):
    x = x.astype(jnp.float32)
    if log10:
        x = 0.0025 * jnp.square(jnp.log2(x))
        x = jnp.minimum(x, 1.0)
    x = jnp.maximum(x, 1.0 / resolution)
    idx = jnp.round(x * resolution).astype(jnp.int32) - 1
    return pe[idx]          # jnp gather clamps OOB, same as the kernel's clip


# -------------------------------- main ----------------------------------------
if __name__ == "__main__":
    d_model, resolution = 32, 100
    pe = make_pe_table(d_model, resolution)

    key0 = jax.random.PRNGKey(0)
    k1, k2 = jax.random.split(key0)

    # ---- small demo shape (batch=2, seq=8), like the module's typical input ----
    B, T = 2, 8
    frac = jax.nn.softmax(jax.random.normal(k1, (B, T), jnp.float32), axis=-1)

    out = fractional_encoder_forward(frac, pe, resolution=resolution, log10=False)
    out = jax.block_until_ready(out)
    assert out.shape == (B, T, d_model // 2)
    assert bool(jnp.all(jnp.isfinite(out)))
    ref = _reference(frac, pe, resolution=resolution, log10=False)
    assert bool(jnp.allclose(out, ref, atol=1e-6)), "mismatch vs reference (log10=False)"

    # ---- log10 branch ----
    out_log = fractional_encoder_forward(frac, pe, resolution=resolution, log10=True)
    out_log = jax.block_until_ready(out_log)
    ref_log = _reference(frac, pe, resolution=resolution, log10=True)
    assert bool(jnp.allclose(out_log, ref_log, atol=1e-6)), "mismatch vs reference (log10=True)"

    # ---- a larger batch that exercises full-size (2048-row) blocks ----
    frac2 = jax.nn.softmax(jax.random.normal(k2, (4, 512), jnp.float32), axis=-1)
    out2 = fractional_encoder_forward(frac2, pe, resolution=resolution, log10=False)
    out2 = jax.block_until_ready(out2)
    ref2 = _reference(frac2, pe, resolution=resolution, log10=False)
    assert out2.shape == (4, 512, d_model // 2)
    assert bool(jnp.allclose(out2, ref2, atol=1e-6)), "mismatch vs reference (large)"

    print("KERNEL_OK")
</pallas_src>

<mosaic_0001>
module attributes {stable_mosaic.version = 11 : i64} {
  func.func @_frac_enc_kernel(%arg0: i32, %arg1: memref<8x8xf32, #tpu.memory_space<vmem>>, %arg2: memref<1024x128xf32, #tpu.memory_space<vmem>>, %arg3: memref<8x128xf32, #tpu.memory_space<vmem>>) attributes {dimension_semantics = [#tpu.dimension_semantics<parallel>], iteration_bounds = array<i64: 2>, scalar_prefetch = 0 : i64, scratch_operands = 0 : i64, tpu.core_type = #tpu.core_type<tc>, window_params = [{transform_indices = @transform_0, window_bounds = array<i64: 8, 8>}, {pipeline_mode = #tpu.pipeline_mode<synchronous>, transform_indices = @transform_1, window_bounds = array<i64: 1024, 128>}, {transform_indices = @transform_2, window_bounds = array<i64: 8, 128>}]} {
    %c0 = arith.constant 0 : index
    %c0_0 = arith.constant 0 : index
    %0 = vector.load %arg1[%c0, %c0_0] : memref<8x8xf32, #tpu.memory_space<vmem>>, vector<8x8xf32>
    %cst = arith.constant 0.00999999977 : f32
    %1 = vector.broadcast %cst : f32 to vector<8x8xf32>
    %2 = arith.maximumf %0, %1 : vector<8x8xf32>
    %cst_1 = arith.constant 1.000000e+02 : f32
    %3 = vector.broadcast %cst_1 : f32 to vector<8x8xf32>
    %4 = arith.mulf %2, %3 : vector<8x8xf32>
    %5 = math.roundeven %4 : vector<8x8xf32>
    %6 = arith.fptosi %5 : vector<8x8xf32> to vector<8x8xi32>
    %c1_i32 = arith.constant 1 : i32
    %7 = vector.broadcast %c1_i32 : i32 to vector<8x8xi32>
    %8 = arith.subi %6, %7 : vector<8x8xi32>
    %c0_i32 = arith.constant 0 : i32
    %c99_i32 = arith.constant 99 : i32
    %9 = vector.broadcast %c0_i32 : i32 to vector<8x8xi32>
    %10 = arith.maxsi %9, %8 : vector<8x8xi32>
    %11 = vector.broadcast %c99_i32 : i32 to vector<8x8xi32>
    %12 = arith.minsi %11, %10 : vector<8x8xi32>
    %13 = tpu.iota {dimensions = array<i32: 1>} : vector<8x1024xi32>
    %cst_2 = arith.constant 0.000000e+00 : f32
    %14 = vector.broadcast %cst_2 : f32 to vector<8x1024xf32>
    %15 = vector.extract_strided_slice %12 {offsets = [0, 0], sizes = [8, 1], strides = [1, 1]} : vector<8x8xi32> to vector<8x1xi32>
    %c0_i32_3 = arith.constant 0 : i32
    %16 = vector.broadcast %c0_i32_3 : i32 to vector<8x1xi32>
    %17 = arith.addi %15, %16 : vector<8x1xi32>
    %18 = vector.broadcast %17 : vector<8x1xi32> to vector<8x1024xi32>
    %19 = arith.cmpi eq, %13, %18 : vector<8x1024xi32>
    %20 = arith.extui %19 : vector<8x1024xi1> to vector<8x1024xi32>
    %21 = arith.sitofp %20 : vector<8x1024xi32> to vector<8x1024xf32>
    %22 = arith.addf %14, %21 : vector<8x1024xf32>
    %23 = vector.extract_strided_slice %12 {offsets = [0, 1], sizes = [8, 1], strides = [1, 1]} : vector<8x8xi32> to vector<8x1xi32>
    %c128_i32 = arith.constant 128 : i32
    %24 = vector.broadcast %c128_i32 : i32 to vector<8x1xi32>
    %25 = arith.addi %23, %24 : vector<8x1xi32>
    %26 = vector.broadcast %25 : vector<8x1xi32> to vector<8x1024xi32>
    %27 = arith.cmpi eq, %13, %26 : vector<8x1024xi32>
    %28 = arith.extui %27 : vector<8x1024xi1> to vector<8x1024xi32>
    %29 = arith.sitofp %28 : vector<8x1024xi32> to vector<8x1024xf32>
    %30 = arith.addf %22, %29 : vector<8x1024xf32>
    %31 = vector.extract_strided_slice %12 {offsets = [0, 2], sizes = [8, 1], strides = [1, 1]} : vector<8x8xi32> to vector<8x1xi32>
    %c256_i32 = arith.constant 256 : i32
    %32 = vector.broadcast %c256_i32 : i32 to vector<8x1xi32>
    %33 = arith.addi %31, %32 : vector<8x1xi32>
    %34 = vector.broadcast %33 : vector<8x1xi32> to vector<8x1024xi32>
    %35 = arith.cmpi eq, %13, %34 : vector<8x1024xi32>
    %36 = arith.extui %35 : vector<8x1024xi1> to vector<8x1024xi32>
    %37 = arith.sitofp %36 : vector<8x1024xi32> to vector<8x1024xf32>
    %38 = arith.addf %30, %37 : vector<8x1024xf32>
    %39 = vector.extract_strided_slice %12 {offsets = [0, 3], sizes = [8, 1], strides = [1, 1]} : vector<8x8xi32> to vector<8x1xi32>
    %c384_i32 = arith.constant 384 : i32
    %40 = vector.broadcast %c384_i32 : i32 to vector<8x1xi32>
    %41 = arith.addi %39, %40 : vector<8x1xi32>
    %42 = vector.broadcast %41 : vector<8x1xi32> to vector<8x1024xi32>
    %43 = arith.cmpi eq, %13, %42 : vector<8x1024xi32>
    %44 = arith.extui %43 : vector<8x1024xi1> to vector<8x1024xi32>
    %45 = arith.sitofp %44 : vector<8x1024xi32> to vector<8x1024xf32>
    %46 = arith.addf %38, %45 : vector<8x1024xf32>
    %47 = vector.extract_strided_slice %12 {offsets = [0, 4], sizes = [8, 1], strides = [1, 1]} : vector<8x8xi32> to vector<8x1xi32>
    %c512_i32 = arith.constant 512 : i32
    %48 = vector.broadcast %c512_i32 : i32 to vector<8x1xi32>
    %49 = arith.addi %47, %48 : vector<8x1xi32>
    %50 = vector.broadcast %49 : vector<8x1xi32> to vector<8x1024xi32>
    %51 = arith.cmpi eq, %13, %50 : vector<8x1024xi32>
    %52 = arith.extui %51 : vector<8x1024xi1> to vector<8x1024xi32>
    %53 = arith.sitofp %52 : vector<8x1024xi32> to vector<8x1024xf32>
    %54 = arith.addf %46, %53 : vector<8x1024xf32>
    %55 = vector.extract_strided_slice %12 {offsets = [0, 5], sizes = [8, 1], strides = [1, 1]} : vector<8x8xi32> to vector<8x1xi32>
    %c640_i32 = arith.constant 640 : i32
    %56 = vector.broadcast %c640_i32 : i32 to vector<8x1xi32>
    %57 = arith.addi %55, %56 : vector<8x1xi32>
    %58 = vector.broadcast %57 : vector<8x1xi32> to vector<8x1024xi32>
    %59 = arith.cmpi eq, %13, %58 : vector<8x1024xi32>
    %60 = arith.extui %59 : vector<8x1024xi1> to vector<8x1024xi32>
    %61 = arith.sitofp %60 : vector<8x1024xi32> to vector<8x1024xf32>
    %62 = arith.addf %54, %61 : vector<8x1024xf32>
    %63 = vector.extract_strided_slice %12 {offsets = [0, 6], sizes = [8, 1], strides = [1, 1]} : vector<8x8xi32> to vector<8x1xi32>
    %c768_i32 = arith.constant 768 : i32
    %64 = vector.broadcast %c768_i32 : i32 to vector<8x1xi32>
    %65 = arith.addi %63, %64 : vector<8x1xi32>
    %66 = vector.broadcast %65 : vector<8x1xi32> to vector<8x1024xi32>
    %67 = arith.cmpi eq, %13, %66 : vector<8x1024xi32>
    %68 = arith.extui %67 : vector<8x1024xi1> to vector<8x1024xi32>
    %69 = arith.sitofp %68 : vector<8x1024xi32> to vector<8x1024xf32>
    %70 = arith.addf %62, %69 : vector<8x1024xf32>
    %71 = vector.extract_strided_slice %12 {offsets = [0, 7], sizes = [8, 1], strides = [1, 1]} : vector<8x8xi32> to vector<8x1xi32>
    %c896_i32 = arith.constant 896 : i32
    %72 = vector.broadcast %c896_i32 : i32 to vector<8x1xi32>
    %73 = arith.addi %71, %72 : vector<8x1xi32>
    %74 = vector.broadcast %73 : vector<8x1xi32> to vector<8x1024xi32>
    %75 = arith.cmpi eq, %13, %74 : vector<8x1024xi32>
    %76 = arith.extui %75 : vector<8x1024xi1> to vector<8x1024xi32>
    %77 = arith.sitofp %76 : vector<8x1024xi32> to vector<8x1024xf32>
    %78 = arith.addf %70, %77 : vector<8x1024xf32>
    %c0_4 = arith.constant 0 : index
    %c0_5 = arith.constant 0 : index
    %79 = vector.load %arg2[%c0_4, %c0_5] : memref<1024x128xf32, #tpu.memory_space<vmem>>, vector<1024x128xf32>
    %cst_6 = arith.constant dense<0.000000e+00> : vector<8x128xf32>
    %80 = tpu.matmul %78, %79, %cst_6 {dimension_numbers = #tpu.dot_dimension_numbers<[1], [0], [0], [1], [0, 0, 1, 1], [], []>} : vector<8x1024xf32>, vector<1024x128xf32>, vector<8x128xf32> -> vector<8x128xf32>
    %c0_7 = arith.constant 0 : index
    %c0_8 = arith.constant 0 : index
    %81 = vector.load %arg3[%c0_7, %c0_8] : memref<8x128xf32, #tpu.memory_space<vmem>>, vector<8x128xf32>
    tpu.vector_store %arg3[%c0_7, %c0_8], %80 {strides = array<i32>} : memref<8x128xf32, #tpu.memory_space<vmem>>, vector<8x128xf32>,
    return
  }
  func.func @transform_0(%arg0: i32) -> (i32, i32) {
    %c0_i32 = arith.constant 0 : i32
    %c0_i32_0 = arith.constant 0 : i32
    return %arg0, %c0_i32 : i32, i32
  }
  func.func @transform_1(%arg0: i32) -> (i32, i32) {
    %c0_i32 = arith.constant 0 : i32
    %c0_i32_0 = arith.constant 0 : i32
    %c0_i32_1 = arith.constant 0 : i32
    return %c0_i32, %c0_i32_0 : i32, i32
  }
  func.func @transform_2(%arg0: i32) -> (i32, i32) {
    %c0_i32 = arith.constant 0 : i32
    %c0_i32_0 = arith.constant 0 : i32
    return %arg0, %c0_i32 : i32, i32
  }
}

</mosaic_0001>

<bundles_post_ra>
// kernel: tpu_custom_call.1
= control target key start
LH: loop header
LB: loop body
LE: loop exit
PB: predicated region body
PF: predicated region fallthrough
CT: control target
= control target key end

     0   :  { %7 = vsyncpa [#allocation3], 0  ;;  %s1598_s0 = inlined_call_operand.vmem [shape: f32[16,8], index: 0, kind: input, shape index: {}]   ;;  %s1599_s1 = inlined_call_operand.hbm [shape: f32[1024,128], index: 1, kind: input, shape index: {}]   ;;  %s1600_s2 = inlined_call_operand.hbm [shape: f32[16,128], index: 2, kind: output, shape index: {}]  }
   0x1   :  { %8 = vsyncpa [#allocation4], 0 }
   0x2   :  { %10 = vsyncpa [#allocation4 + $0x1], 0  ;;  %s1112_s9 = smov 0   ;;  %s1114_s10 = smov 0  }
   0x3   :  { %s1116_s11 = smov 0   ;;  %s1118_s12 = smov 0  }
   0x4 LB: > { %s1133_s13 = sadd.s32 4294967295, %s1083_s12   ;;  %s837_s14 = sadd.s32 4294967294, %s1083_s12   ;;  %s1083_s12 = sphi %s1118_s12, %s1606_s12   ;;  %s1079_s11 = sphi %s1116_s11, %s1605_s11   ;;  %s1075_s10 = sphi %s1114_s10, %s1604_s10   ;;  %s1071_s9 = sphi %s1112_s9, %s1603_s9  }
   0x5   : > { %s1137_s15 = sadd.s32 1, %s1083_s12   ;;  %s70_s16 = sadd.s32 1, %s1079_s11 }
   0x6   : > { %s67_s17 = ssub.s32 %s1083_s12, %s1137_s15  ;;  %p80_p0 = scmp.ne.s32.totalorder %s1079_s11, %s1075_s10 }
   0x7   : > { %p68_p1 = scmp.eq.s32.totalorder %s67_s17, 0  ;;  %p81_p2 = scmp.eq.s32.totalorder %s1133_s13, 1 }
   0x8   : > { %p86_p3 = scmp.ne.s32.totalorder %s1075_s10, %s1071_s9  ;;  %p87_p4 = scmp.eq.s32.totalorder %s837_s14, 1 }
   0x9   : > { %s1148_s18 = scalar_select %p68_p1, %s1079_s11, %s70_s16  }
   0xa   : > { %p1150_p5 = por %p81_p2, %p80_p0  ;;  %p1154_p6 = por %p87_p4, %p86_p3 }
   0xb   : > { %p838_p7 = scmp.ge.s32.totalorder %s1083_s12, 1  ;;  %p94_p8 = scmp.lt.s32.totalorder %s1083_s12, 3 }
   0xc   : > { %p931_p9 = scmp.eq.s32.totalorder %s1133_s13, 0  ;;  %s105_s23 = sshll.u32 %s1599_s1, 4  ;;  %s106_s23 = int_to_ptr.hbm [resolvable:$true] %s105_s23 }
   0xd   : > { %p95_p10 = pnand %p838_p7, %p94_p8  ;;  %s1085_s24 = smov [#allocation2]  }
   0xe   : > { %s107_s25 = sshll.u32 %s1085_s24, 4  ;;  %s1086_s26 = smov 128   ;;  %s108_s25 = int_to_ptr.vmem [resolvable:$true] %s107_s25 }
   0xf   : > { %p923_p11 = pneg %p95_p10  ;;  %s1087_s27 = smov 8  }
  0x10   : > { %130 = sbr.rel (%p95_p10) target bundleno = 339 (0x153), region = 28 }
  0x11   : > { %p924_p12 = pnand %p931_p9, %p923_p11 }
  0x13   : > { %926 = dma.hbm_to_vmem [thread:$0]  (!%p924_p12), %s106_s23, 16384, %s108_s25, [#allocation3], %s1086_s26, %s1086_s26, %s1087_s27  }
  0x15   : > { %1062 = dma.done.wait (%p931_p9), [#allocation3], 16384  }
  0x16   : > { %1064 = vsyncadd (%p931_p9), [#allocation3], 4294950912  ;;  %p152_p13 = scmp.lt.s32.totalorder %s1133_s13, 1  ;;  %v1088_v0 = vmov 0   ;;  %v1089_v1 = vmov 2   ;;  %v1090_v4 = vmov 4  }
  0x17   : > { %978 = vset.pattern.permute.xlu0 %v1088_v0  ;;  %980 = vset.pattern.permute.xlu1 %v1089_v1  ;;  %v476_v5 = vld [vmem:[#allocation2 + $0x78] sm:$0xff]  ;;  %v475_v10 = vld [vmem:[#allocation2 + $0x70] sm:$0xff]  ;;  %v474_v14 = vld [vmem:[#allocation2 + $0x68] sm:$0xff]  ;;  %v1091_v50 = vmov 1   ;;  %v1092_v53 = vmov 3   ;;  %v1093_v56 = vmov 5  }
  0x18   : > { %s153_s28 = scalar_select %p152_p13, %s1133_s13, 1  ;;  %982 = vset.pattern.permute.xlu2 %v1090_v4  ;;  %v492_v6 = vld [vmem:[#allocation2 + $0xf8] sm:$0xff]  ;;  %589 = vmatpush.msra.mxu0 %v476_v5  ;;  %v491_v11 = vld [vmem:[#allocation2 + $0xf0] sm:$0xff]  ;;  %v490_v16 = vld [vmem:[#allocation2 + $0xe8] sm:$0xff] }
  0x19   : > { %v508_v7 = vld [vmem:[#allocation2 + $0x178] sm:$0xff]  ;;  %609 = vmatpush.msra.mxu1 %v492_v6  ;;  %v507_v12 = vld [vmem:[#allocation2 + $0x170] sm:$0xff]  ;;  %v506_v17 = vld [vmem:[#allocation2 + $0x168] sm:$0xff]  ;;  %s149_s5 = sand.u32 1, %s1075_s10   ;;  %s911_s7 = sshll.u32 %s1133_s13, 3 }
  0x1a   : > { %s844_s29 = sshll.u32 %s153_s28, 3  ;;  %v524_v9 = vld [vmem:[#allocation2 + $0x1f8] sm:$0xff]  ;;  %629 = vmatpush.msra.mxu2 %v508_v7  ;;  %v523_v13 = vld [vmem:[#allocation2 + $0x1f0] sm:$0xff]  ;;  %590 = vmatpush.msra.mxu0 %v475_v10  ;;  %v522_v18 = vld [vmem:[#allocation2 + $0x1e8] sm:$0xff]  ;;  %v1094_v7 = vmov 6   ;;  %v1095_v10 = vmov 7   ;;  %s761_s16 = scalar_lea.hbm %s1600_s2, %s911_s7 }
  0x1b   : > { %s155_s4 = scalar_lea.vmem %s1598_s0, %s844_s29  ;;  %649 = vmatpush.msra.mxu3 %v524_v9  ;;  %610 = vmatpush.msra.mxu1 %v491_v11  ;;  %v473_v19 = vld [vmem:[#allocation2 + $0x60] sm:$0xff]  ;;  %v472_v24 = vld [vmem:[#allocation2 + $0x58] sm:$0xff]  ;;  %v471_v29 = vld [vmem:[#allocation2 + $0x50] sm:$0xff]  ;;  %s843_s6 = sshll.u32 %s149_s5, 3 }
  0x1c   : > { %v156_v2 = vld [vmem:[%s155_s4] sm:$0xff]  ;;  %630 = vmatpush.msra.mxu2 %v507_v12  ;;  %591 = vmatpush.msra.mxu0 %v474_v14  ;;  %v488_v25 = vld [vmem:[#allocation2 + $0xd8] sm:$0xff]  ;;  %v487_v30 = vld [vmem:[#allocation2 + $0xd0] sm:$0xff]  ;;  %s151_s17 = scalar_lea.vmem [#allocation5], %s843_s6  ;;  %s765_s22 = sshll.u32 %s761_s16, 4  ;;  %s766_s22 = int_to_ptr.hbm [resolvable:$true] %s765_s22 }
  0x1d   : > { %v157_v3 = vmax.f32 %v156_v2, 0.01  ;;  %650 = vmatpush.msra.mxu3 %v523_v13  ;;  %v489_v20 = vld [vmem:[#allocation2 + $0xe0] sm:$0xff]  ;;  %611 = vmatpush.msra.mxu1 %v490_v16  ;;  %v504_v26 = vld [vmem:[#allocation2 + $0x158] sm:$0xff]  ;;  %v503_v31 = vld [vmem:[#allocation2 + $0x150] sm:$0xff]  ;;  %s763_s21 = sshll.u32 %s151_s17, 4  ;;  %s764_s21 = int_to_ptr.vmem [resolvable:$true] %s763_s21 }
  0x1e   : > { %v505_v22 = vld [vmem:[#allocation2 + $0x160] sm:$0xff]  ;;  %631 = vmatpush.msra.mxu2 %v506_v17  ;;  %592 = vmatpush.msra.mxu0 %v473_v19  ;;  %v520_v27 = vld [vmem:[#allocation2 + $0x1d8] sm:$0xff]  ;;  %v519_v33 = vld [vmem:[#allocation2 + $0x1d0] sm:$0xff]  ;;  %s751_s23 = scalar_lea.sflag [#allocation4], %s149_s5  ;;  %s1031_s24 = sshra.s32 %s766_s22, 4  ;;  %s1032_s24 = int_to_ptr.hbm [resolvable:$true] %s1031_s24 }
  0x1f   : > { %v158_v8 = vmul.f32 100.0, %v157_v3  ;;  %v521_v23 = vld [vmem:[#allocation2 + $0x1e0] sm:$0xff]  ;;  %651 = vmatpush.msra.mxu3 %v522_v18  ;;  %612 = vmatpush.msra.mxu1 %v489_v20  ;;  %v470_v35 = vld [vmem:[#allocation2 + $0x48] sm:$0xff]  ;;  %v468_v44 = vld [vmem:[#allocation2 + $0x38] sm:$0xff]  ;;  %s1033_s13 = scalar_lea.hbm %s1032_s24, 8  ;;  %s1037_s27 = scalar_lea.hbm %s1600_s2, 16 }
  0x20   : > { %632 = vmatpush.msra.mxu2 %v505_v22  ;;  %593 = vmatpush.msra.mxu0 %v472_v24  ;;  %v486_v37 = vld [vmem:[#allocation2 + $0xc8] sm:$0xff]  ;;  %v469_v40 = vld [vmem:[#allocation2 + $0x40] sm:$0xff]  ;;  %v484_v46 = vld [vmem:[#allocation2 + $0xb8] sm:$0xff]  ;;  %p1034_p0 = scmp.ne.s32.totalorder %s1032_s24, %s1033_s13  ;;  %p1038_p3 = scmp.lt.s32.totalorder %s1032_s24, %s1600_s2 }
  0x21   : > { %v916_v15 = vcvt.f32.s32 %v158_v8  ;;  %652 = vmatpush.msra.mxu3 %v521_v23  ;;  %613 = vmatpush.msra.mxu1 %v488_v25  ;;  %v502_v38 = vld [vmem:[#allocation2 + $0x148] sm:$0xff]  ;;  %v485_v41 = vld [vmem:[#allocation2 + $0xc0] sm:$0xff]  ;;  %v500_v47 = vld [vmem:[#allocation2 + $0x138] sm:$0xff]  ;;  %p1039_p4 = scmp.lt.s32.totalorder %s1037_s27, %s1033_s13 }
  0x22   : > { %633 = vmatpush.msra.mxu2 %v504_v26  ;;  %594 = vmatpush.msra.mxu0 %v471_v29  ;;  %v518_v39 = vld [vmem:[#allocation2 + $0x1c8] sm:$0xff]  ;;  %v501_v42 = vld [vmem:[#allocation2 + $0x140] sm:$0xff]  ;;  %v516_v49 = vld [vmem:[#allocation2 + $0x1b8] sm:$0xff]  ;;  %p1035_p1 = pnand %p1034_p0, %p1150_p5 }
  0x23   : > { %v845_v21 = vadd.s32 4294967295, %v916_v15  ;;  %653 = vmatpush.msra.mxu3 %v520_v27  ;;  %614 = vmatpush.msra.mxu1 %v487_v30  ;;  %v517_v43 = vld [vmem:[#allocation2 + $0x1c0] sm:$0xff]  ;;  %v467_v52 = vld [vmem:[#allocation2 + $0x30] sm:$0xff]  ;;  %v466_v58 = vld [vmem:[#allocation2 + $0x28] sm:$0xff]  ;;  %p1040_p7 = por %p1039_p4, %p1038_p3 }
  0x24   : > { %634 = vmatpush.msra.mxu2 %v503_v31  ;;  %595 = vmatpush.msra.mxu0 %v470_v35  ;;  %v483_v54 = vld [vmem:[#allocation2 + $0xb0] sm:$0xff]  ;;  %v482_v59 = vld [vmem:[#allocation2 + $0xa8] sm:$0xff]  ;;  %v465_v62 = vld [vmem:[#allocation2 + $0x20] sm:$0xff]  ;;  %p1036_p2 = pneg %p1035_p1 }
  0x25   : > { %vm161_vm0 = vcmp.gt.s32.totalorder %v845_v21, 0  ;;  %654 = vmatpush.msra.mxu3 %v519_v33  ;;  %615 = vmatpush.msra.mxu1 %v486_v37  ;;  %v499_v55 = vld [vmem:[#allocation2 + $0x130] sm:$0xff]  ;;  %v498_v60 = vld [vmem:[#allocation2 + $0x128] sm:$0xff]  ;;  %v481_v63 = vld [vmem:[#allocation2 + $0xa0] sm:$0xff] }
  0x26   : > { %v162_v28 = vsel %vm161_vm0, %v845_v21, 0  ;;  %635 = vmatpush.msra.mxu2 %v502_v38  ;;  %596 = vmatpush.msra.mxu0 %v469_v40  ;;  %v515_v57 = vld [vmem:[#allocation2 + $0x1b0] sm:$0xff]  ;;  %v514_v61 = vld [vmem:[#allocation2 + $0x1a8] sm:$0xff]  ;;  %v497_v0 = vld [vmem:[#allocation2 + $0x120] sm:$0xff]  ;;  %p1041_p8 = pnand %p1040_p7, %p1036_p2 }
  0x27   : > { %vm163_vm1 = vcmp.lt.s32.totalorder %v162_v28, 99  ;;  %655 = vmatpush.msra.mxu3 %v518_v39  ;;  %616 = vmatpush.msra.mxu1 %v485_v41  ;;  %v513_v1 = vld [vmem:[#allocation2 + $0x1a0] sm:$0xff]  ;;  %v464_v2 = vld [vmem:[#allocation2 + $0x18] sm:$0xff]  ;;  %v463_v9 = vld [vmem:[#allocation2 + $0x10] sm:$0xff] }
  0x28   : > { %v1175_v32 = vsel %vm163_vm1, %v162_v28, 99  ;;  %636 = vmatpush.msra.mxu2 %v501_v42  ;;  %597 = vmatpush.msra.mxu0 %v468_v44  ;;  %v480_v4 = vld [vmem:[#allocation2 + $0x98] sm:$0xff]  ;;  %v479_v11 = vld [vmem:[#allocation2 + $0x90] sm:$0xff]  ;;  %v462_v14 = vld [vmem:[#allocation2 + $0x8] sm:$0xff] }
  0x29   : > { %175 = vperm.xlu0 %978, %v1175_v32   ;;  %v245_v34 = vadd.s32 256, %v1175_v32  ;;  %v317_v36 = vadd.s32 512, %v1175_v32  ;;  %v209_v45 = vadd.s32 128, %v1175_v32  ;;  %v281_v48 = vadd.s32 384, %v1175_v32  ;;  %656 = vmatpush.msra.mxu3 %v517_v43  ;;  %v496_v6 = vld [vmem:[#allocation2 + $0x118] sm:$0xff]  ;;  %v495_v12 = vld [vmem:[#allocation2 + $0x110] sm:$0xff] }
  0x2a   : > { %v353_v51 = vadd.s32 640, %v1175_v32  ;;  %617 = vmatpush.msra.mxu1 %v484_v46  ;;  %637 = vmatpush.msra.mxu2 %v500_v47  ;;  %v389_v3 = vadd.s32 768, %v1175_v32  ;;  %v425_v5 = vadd.s32 896, %v1175_v32  ;;  %v512_v8 = vld [vmem:[#allocation2 + $0x198] sm:$0xff]  ;;  %v511_v13 = vld [vmem:[#allocation2 + $0x190] sm:$0xff]  ;;  %v478_v15 = vld [vmem:[#allocation2 + $0x88] sm:$0xff] }
  0x2b   : > { %247 = vperm.xlu1 %980, %v245_v34   ;;  %319 = vperm.xlu2 %982, %v317_v36   ;;  %v494_v16 = vld [vmem:[#allocation2 + $0x108] sm:$0xff]  ;;  %v461_v18 = vld [vmem:[#allocation2] sm:$0xff]  ;;  %v540_v22 = vld [vmem:[#allocation2 + $0x278] sm:$0xff] }
  0x2c   : > { %657 = vmatpush.msra.mxu3 %v516_v49  ;;  %598 = vmatpush.msra.mxu0 %v467_v52  ;;  %v510_v17 = vld [vmem:[#allocation2 + $0x188] sm:$0xff]  ;;  %v477_v19 = vld [vmem:[#allocation2 + $0x80] sm:$0xff]  ;;  %v556_v23 = vld [vmem:[#allocation2 + $0x2f8] sm:$0xff] }
  0x2d   : > { %618 = vmatpush.msra.mxu1 %v483_v54  ;;  %638 = vmatpush.msra.mxu2 %v499_v55  ;;  %v493_v20 = vld [vmem:[#allocation2 + $0x100] sm:$0xff]  ;;  %v572_v24 = vld [vmem:[#allocation2 + $0x378] sm:$0xff]  ;;  %v539_v26 = vld [vmem:[#allocation2 + $0x270] sm:$0xff] }
  0x2e   : > { %658 = vmatpush.msra.mxu3 %v515_v57  ;;  %599 = vmatpush.msra.mxu0 %v466_v58  ;;  %v509_v21 = vld [vmem:[#allocation2 + $0x180] sm:$0xff]  ;;  %v588_v25 = vld [vmem:[#allocation2 + $0x3f8] sm:$0xff]  ;;  %v555_v27 = vld [vmem:[#allocation2 + $0x2f0] sm:$0xff] }
  0x2f   : > { %619 = vmatpush.msra.mxu1 %v482_v59  ;;  %639 = vmatpush.msra.mxu2 %v498_v60  ;;  %v571_v28 = vld [vmem:[#allocation2 + $0x370] sm:$0xff]  ;;  %v538_v30 = vld [vmem:[#allocation2 + $0x268] sm:$0xff]  ;;  %v537_v34 = vld [vmem:[#allocation2 + $0x260] sm:$0xff] }
  0x30   : > { %659 = vmatpush.msra.mxu3 %v514_v61  ;;  %600 = vmatpush.msra.mxu0 %v465_v62  ;;  %v587_v29 = vld [vmem:[#allocation2 + $0x3f0] sm:$0xff]  ;;  %v554_v31 = vld [vmem:[#allocation2 + $0x2e8] sm:$0xff]  ;;  %v553_v35 = vld [vmem:[#allocation2 + $0x2e0] sm:$0xff] }
  0x31   : > { %979 = vset.pattern.permute.xlu0 %v1091_v50  ;;  %620 = vmatpush.msra.mxu1 %v481_v63  ;;  %v570_v32 = vld [vmem:[#allocation2 + $0x368] sm:$0xff]  ;;  %v569_v36 = vld [vmem:[#allocation2 + $0x360] sm:$0xff]  ;;  %v536_v39 = vld [vmem:[#allocation2 + $0x258] sm:$0xff] }
  0x32   : > { %211 = vperm.xlu0 %979, %v209_v45   ;;  %640 = vmatpush.msra.mxu2 %v497_v0  ;;  %v586_v33 = vld [vmem:[#allocation2 + $0x3e8] sm:$0xff]  ;;  %v585_v37 = vld [vmem:[#allocation2 + $0x3e0] sm:$0xff]  ;;  %v552_v40 = vld [vmem:[#allocation2 + $0x2d8] sm:$0xff] }
  0x33   : > { %981 = vset.pattern.permute.xlu1 %v1092_v53  ;;  %983 = vset.pattern.permute.xlu2 %v1093_v56  ;;  %v568_v41 = vld [vmem:[#allocation2 + $0x358] sm:$0xff]  ;;  %v535_v43 = vld [vmem:[#allocation2 + $0x250] sm:$0xff]  ;;  %v534_v47 = vld [vmem:[#allocation2 + $0x248] sm:$0xff] }
  0x34   : > { %283 = vperm.xlu1 %981, %v281_v48   ;;  %355 = vperm.xlu2 %983, %v353_v51   ;;  %v584_v42 = vld [vmem:[#allocation2 + $0x3d8] sm:$0xff]  ;;  %v551_v44 = vld [vmem:[#allocation2 + $0x2d0] sm:$0xff]  ;;  %v550_v48 = vld [vmem:[#allocation2 + $0x2c8] sm:$0xff]  ;;  %v165_v51 = vlaneseq }
  0x35   : > { %660 = vmatpush.msra.mxu3 %v513_v1  ;;  %601 = vmatpush.msra.mxu0 %v464_v2  ;;  %v567_v45 = vld [vmem:[#allocation2 + $0x350] sm:$0xff]  ;;  %v566_v49 = vld [vmem:[#allocation2 + $0x348] sm:$0xff]  ;;  %v533_v52 = vld [vmem:[#allocation2 + $0x240] sm:$0xff] }
  0x36   : > { %621 = vmatpush.msra.mxu1 %v480_v4  ;;  %641 = vmatpush.msra.mxu2 %v496_v6  ;;  %v583_v46 = vld [vmem:[#allocation2 + $0x3d0] sm:$0xff]  ;;  %v582_v50 = vld [vmem:[#allocation2 + $0x3c8] sm:$0xff]  ;;  %v549_v53 = vld [vmem:[#allocation2 + $0x2c0] sm:$0xff]  ;;  %v1187_v60 = vand.u32 127, %v165_v51 }
  0x37   : > { %661 = vmatpush.msra.mxu3 %v512_v8  ;;  %602 = vmatpush.msra.mxu0 %v463_v9  ;;  %v565_v54 = vld [vmem:[#allocation2 + $0x340] sm:$0xff]  ;;  %v532_v56 = vld [vmem:[#allocation2 + $0x238] sm:$0xff]  ;;  %v531_v62 = vld [vmem:[#allocation2 + $0x230] sm:$0xff] }
  0x38   : > { %622 = vmatpush.msra.mxu1 %v479_v11  ;;  %642 = vmatpush.msra.mxu2 %v495_v12  ;;  %v581_v55 = vld [vmem:[#allocation2 + $0x3c0] sm:$0xff]  ;;  %v548_v57 = vld [vmem:[#allocation2 + $0x2b8] sm:$0xff]  ;;  %v547_v63 = vld [vmem:[#allocation2 + $0x2b0] sm:$0xff]  ;;  %v1192_v8 = vadd.s32 128, %v1187_v60  ;;  %v1195_v9 = vadd.s32 256, %v1187_v60  ;;  %v1200_v12 = vadd.s32 384, %v1187_v60 }
  0x39   : > { %662 = vmatpush.msra.mxu3 %v511_v13  ;;  %603 = vmatpush.msra.mxu0 %v462_v14  ;;  %v564_v58 = vld [vmem:[#allocation2 + $0x338] sm:$0xff]  ;;  %v563_v0 = vld [vmem:[#allocation2 + $0x330] sm:$0xff]  ;;  %v530_v2 = vld [vmem:[#allocation2 + $0x228] sm:$0xff]  ;;  %v1203_v13 = vadd.s32 512, %v1187_v60  ;;  %v1210_v14 = vadd.s32 640, %v1187_v60 }
  0x3a   : > { %623 = vmatpush.msra.mxu1 %v478_v15  ;;  %643 = vmatpush.msra.mxu2 %v494_v16  ;;  %v580_v59 = vld [vmem:[#allocation2 + $0x3b8] sm:$0xff]  ;;  %v579_v1 = vld [vmem:[#allocation2 + $0x3b0] sm:$0xff]  ;;  %v562_v4 = vld [vmem:[#allocation2 + $0x328] sm:$0xff]  ;;  %v1215_v15 = vadd.s32 768, %v1187_v60  ;;  %v1218_v16 = vadd.s32 896, %v1187_v60 }
  0x3b   : > { %663 = vmatpush.msra.mxu3 %v510_v17  ;;  %986 = vset.pattern.permute.xlu0 %v1095_v10  ;;  %v529_v6 = vld [vmem:[#allocation2 + $0x220] sm:$0xff]  ;;  %v1096_v17 = vmov 0.0  }
  0x3c   : > { %984 = vset.pattern.permute.xlu1 %v1094_v7  ;;  %985 = vset.pattern.permute.xlu2 %v1095_v10  ;;  %v545_v7 = vld [vmem:[#allocation2 + $0x2a0] sm:$0xff] }
  0x3d   : > { %391 = vperm.xlu1 %984, %v389_v3   ;;  %427 = vperm.xlu2 %985, %v425_v5   ;;  %v546_v3 = vld [vmem:[#allocation2 + $0x2a8] sm:$0xff]  ;;  %v561_v10 = vld [vmem:[#allocation2 + $0x320] sm:$0xff] }
  0x3e   : > { %604 = vmatpush.msra.mxu0 %v461_v18  ;;  %624 = vmatpush.msra.mxu1 %v477_v19  ;;  %v578_v5 = vld [vmem:[#allocation2 + $0x3a8] sm:$0xff]  ;;  %v577_v11 = vld [vmem:[#allocation2 + $0x3a0] sm:$0xff] }
  0x3f   : > { %644 = vmatpush.msra.mxu2 %v493_v20  ;;  %664 = vmatpush.msra.mxu3 %v509_v21  ;;  %v541_v51 = vld [vmem:[#allocation2 + $0x280] sm:$0xff] }
  0x40   : > { %669 = vmatpush.msrb.mxu0 %v540_v22  ;;  %689 = vmatpush.msrb.mxu1 %v556_v23  ;;  %v528_v23 = vld [vmem:[#allocation2 + $0x218] sm:$0xff] }
  0x41   : > { %709 = vmatpush.msrb.mxu2 %v572_v24  ;;  %729 = vmatpush.msrb.mxu3 %v588_v25  ;;  %v544_v24 = vld [vmem:[#allocation2 + $0x298] sm:$0xff] }
  0x42   : > { %670 = vmatpush.msrb.mxu0 %v539_v26  ;;  %690 = vmatpush.msrb.mxu1 %v555_v27 }
  0x43   : > { %710 = vmatpush.msrb.mxu2 %v571_v28  ;;  %730 = vmatpush.msrb.mxu3 %v587_v29  ;;  %v560_v28 = vld [vmem:[#allocation2 + $0x318] sm:$0xff] }
  0x44   : > { %671 = vmatpush.msrb.mxu0 %v538_v30  ;;  %691 = vmatpush.msrb.mxu1 %v554_v31  ;;  %v576_v29 = vld [vmem:[#allocation2 + $0x398] sm:$0xff]  ;;  %v527_v30 = vld [vmem:[#allocation2 + $0x210] sm:$0xff] }
  0x45   : > { %711 = vmatpush.msrb.mxu2 %v570_v32  ;;  %731 = vmatpush.msrb.mxu3 %v586_v33 }
  0x46   : > { %672 = vmatpush.msrb.mxu0 %v537_v34  ;;  %692 = vmatpush.msrb.mxu1 %v553_v35  ;;  %v543_v35 = vld [vmem:[#allocation2 + $0x290] sm:$0xff] }
  0x47   : > { %712 = vmatpush.msrb.mxu2 %v569_v36  ;;  %732 = vmatpush.msrb.mxu3 %v585_v37  ;;  %v559_v36 = vld [vmem:[#allocation2 + $0x310] sm:$0xff] }
  0x48   : > { %673 = vmatpush.msrb.mxu0 %v536_v39  ;;  %693 = vmatpush.msrb.mxu1 %v552_v40  ;;  %v575_v37 = vld [vmem:[#allocation2 + $0x390] sm:$0xff] }
  0x49   : > { %713 = vmatpush.msrb.mxu2 %v568_v41  ;;  %733 = vmatpush.msrb.mxu3 %v584_v42  ;;  %v526_v41 = vld [vmem:[#allocation2 + $0x208] sm:$0xff] }
  0x4a   : > { %674 = vmatpush.msrb.mxu0 %v535_v43  ;;  %694 = vmatpush.msrb.mxu1 %v551_v44  ;;  %v542_v42 = vld [vmem:[#allocation2 + $0x288] sm:$0xff] }
  0x4b   : > { %714 = vmatpush.msrb.mxu2 %v567_v45  ;;  %734 = vmatpush.msrb.mxu3 %v583_v46 }
  0x4c   : > { %675 = vmatpush.msrb.mxu0 %v534_v47  ;;  %695 = vmatpush.msrb.mxu1 %v550_v48  ;;  %v558_v47 = vld [vmem:[#allocation2 + $0x308] sm:$0xff] }
  0x4d   : > { %715 = vmatpush.msrb.mxu2 %v566_v49  ;;  %735 = vmatpush.msrb.mxu3 %v582_v50  ;;  %v574_v48 = vld [vmem:[#allocation2 + $0x388] sm:$0xff]  ;;  %v525_v50 = vld [vmem:[#allocation2 + $0x200] sm:$0xff] }
  0x4e   : > { %676 = vmatpush.msrb.mxu0 %v533_v52  ;;  %696 = vmatpush.msrb.mxu1 %v549_v53  ;;  %v557_v53 = vld [vmem:[#allocation2 + $0x300] sm:$0xff] }
  0x4f   : > { %716 = vmatpush.msrb.mxu2 %v565_v54  ;;  %736 = vmatpush.msrb.mxu3 %v581_v55  ;;  %v573_v54 = vld [vmem:[#allocation2 + $0x380] sm:$0xff] }
  0x50   : > { %677 = vmatpush.msrb.mxu0 %v532_v56  ;;  %697 = vmatpush.msrb.mxu1 %v548_v57 }
  0x51   : > { %717 = vmatpush.msrb.mxu2 %v564_v58  ;;  %737 = vmatpush.msrb.mxu3 %v580_v59 }
  0x52   : > { %678 = vmatpush.msrb.mxu0 %v531_v62  ;;  %698 = vmatpush.msrb.mxu1 %v547_v63 }
  0x53   : > { %718 = vmatpush.msrb.mxu2 %v563_v0  ;;  %738 = vmatpush.msrb.mxu3 %v579_v1 }
  0x54   : > { %679 = vmatpush.msrb.mxu0 %v530_v2  ;;  %699 = vmatpush.msrb.mxu1 %v546_v3 }
  0x55   : > { %719 = vmatpush.msrb.mxu2 %v562_v4  ;;  %739 = vmatpush.msrb.mxu3 %v578_v5 }
  0x56   : > { %680 = vmatpush.msrb.mxu0 %v529_v6  ;;  %700 = vmatpush.msrb.mxu1 %v545_v7 }
  0x57   : > { %720 = vmatpush.msrb.mxu2 %v561_v10  ;;  %740 = vmatpush.msrb.mxu3 %v577_v11 }
  0x58   : > { %681 = vmatpush.msrb.mxu0 %v528_v23  ;;  %701 = vmatpush.msrb.mxu1 %v544_v24 }
  0x59   : > { %721 = vmatpush.msrb.mxu2 %v560_v28  ;;  %741 = vmatpush.msrb.mxu3 %v576_v29 }
  0x5a   : > { %682 = vmatpush.msrb.mxu0 %v527_v30  ;;  %702 = vmatpush.msrb.mxu1 %v543_v35 }
  0x5b   : > { %722 = vmatpush.msrb.mxu2 %v559_v36  ;;  %742 = vmatpush.msrb.mxu3 %v575_v37 }
  0x5c   : > { %683 = vmatpush.msrb.mxu0 %v526_v41  ;;  %703 = vmatpush.msrb.mxu1 %v542_v42 }
  0x5d   : > { %723 = vmatpush.msrb.mxu2 %v558_v47  ;;  %743 = vmatpush.msrb.mxu3 %v574_v48 }
  0x5e   : > { %684 = vmatpush.msrb.mxu0 %v525_v50  ;;  %704 = vmatpush.msrb.mxu1 %v541_v51 }
  0x5f   : > { %724 = vmatpush.msrb.mxu2 %v557_v53  ;;  %744 = vmatpush.msrb.mxu3 %v573_v54 }
  0x85   : > { %v1185_v38 = vpop.permute.xlu2 %319 }
  0x86   : > { %vm321_vm2 = vcmp.eq.s32.totalorder %v1187_v60, %v1185_v38  ;;  %vm322_vm3 = vcmp.eq.s32.totalorder %v1192_v8, %v1185_v38  ;;  %vm323_vm4 = vcmp.eq.s32.totalorder %v1195_v9, %v1185_v38  ;;  %vm324_vm5 = vcmp.eq.s32.totalorder %v1200_v12, %v1185_v38 }
  0x87   : > { %v1224_v18 = vsel %vm321_vm2, 1.0, %v1096_v17  ;;  %vm325_vm6 = vcmp.eq.s32.totalorder %v1203_v13, %v1185_v38  ;;  %v1233_v20 = vsel %vm322_vm3, 1.0, %v1096_v17  ;;  %v1236_v21 = vsel %vm323_vm4, 1.0, %v1096_v17 }
  0x88   : > { %vm326_vm8 = vcmp.eq.s32.totalorder %v1210_v14, %v1185_v38  ;;  %v1245_v22 = vsel %vm324_vm5, 1.0, %v1096_v17  ;;  %v1252_v25 = vsel %vm325_vm6, 1.0, %v1096_v17 }
  0x89   : > { %v1271_v31 = vsel %vm326_vm8, 1.0, %v1096_v17 }
  0x8e   : > { %v1189_v61 = vpop.permute.xlu2 %355 }
  0x8f   : > { %vm357_vm7 = vcmp.eq.s32.totalorder %v1187_v60, %v1189_v61  ;;  %vm358_vm9 = vcmp.eq.s32.totalorder %v1192_v8, %v1189_v61  ;;  %vm359_vm10 = vcmp.eq.s32.totalorder %v1195_v9, %v1189_v61  ;;  %vm360_vm11 = vcmp.eq.s32.totalorder %v1200_v12, %v1189_v61 }
  0x90   : > { %vm361_vm13 = vcmp.eq.s32.totalorder %v1203_v13, %v1189_v61  ;;  %vm362_vm14 = vcmp.eq.s32.totalorder %v1210_v14, %v1189_v61  ;;  %v1261_v27 = vsel %vm357_vm7, 1.0, %v1096_v17  ;;  %v1277_v32 = vsel %vm358_vm9, 1.0, %v1096_v17 }
  0x91   : > { %v1283_v33 = vsel %vm359_vm10, 1.0, %v1096_v17  ;;  %v1289_v34 = vsel %vm360_vm11, 1.0, %v1096_v17  ;;  %v1307_v43 = vsel %vm361_vm13, 1.0, %v1096_v17  ;;  %v1313_v44 = vsel %vm362_vm14, 1.0, %v1096_v17 }
  0x97   : > { %v1228_v19 = vpop.permute.xlu2 %427 }
  0x98   : > { %vm429_vm12 = vcmp.eq.s32.totalorder %v1187_v60, %v1228_v19  ;;  %vm430_vm15 = vcmp.eq.s32.totalorder %v1192_v8, %v1228_v19  ;;  %vm431_vm0 = vcmp.eq.s32.totalorder %v1195_v9, %v1228_v19  ;;  %vm432_vm1 = vcmp.eq.s32.totalorder %v1200_v12, %v1228_v19 }
  0x99   : > { %v1301_v40 = vsel %vm429_vm12, 1.0, %v1096_v17  ;;  %v1321_v45 = vsel %vm430_vm15, 1.0, %v1096_v17  ;;  %v1327_v46 = vsel %vm431_vm0, 1.0, %v1096_v17  ;;  %vm433_vm4 = vcmp.eq.s32.totalorder %v1203_v13, %v1228_v19 }
  0x9a   : > { %v1341_v49 = vsel %vm432_vm1, 1.0, %v1096_v17  ;;  %v1405_v3 = vsel %vm433_vm4, 1.0, %v1096_v17 }
  0x9b   : > { %v1258_v26 = vpop.permute.xlu0 %175 }
  0x9c   : > { %vm177_vm2 = vcmp.eq.s32.totalorder %v1187_v60, %v1258_v26  ;;  %vm178_vm3 = vcmp.eq.s32.totalorder %v1192_v8, %v1258_v26  ;;  %vm179_vm6 = vcmp.eq.s32.totalorder %v1195_v9, %v1258_v26  ;;  %vm180_vm7 = vcmp.eq.s32.totalorder %v1200_v12, %v1258_v26 }
  0x9d   : > { %v1293_v39 = vpop.permute.xlu1 %247  ;;  %v846_v52 = vsel %vm177_vm2, 1.0, %v1096_v17  ;;  %v847_v55 = vsel %vm178_vm3, 1.0, %v1096_v17  ;;  %vm181_vm11 = vcmp.eq.s32.totalorder %v1203_v13, %v1258_v26  ;;  %vm182_vm13 = vcmp.eq.s32.totalorder %v1210_v14, %v1258_v26 }
  0x9e   : > { %vm249_vm5 = vcmp.eq.s32.totalorder %v1187_v60, %v1293_v39  ;;  %vm250_vm8 = vcmp.eq.s32.totalorder %v1192_v8, %v1293_v39  ;;  %vm251_vm9 = vcmp.eq.s32.totalorder %v1195_v9, %v1293_v39  ;;  %vm252_vm10 = vcmp.eq.s32.totalorder %v1200_v12, %v1293_v39 }
  0x9f   : > { %vm253_vm12 = vcmp.eq.s32.totalorder %v1203_v13, %v1293_v39  ;;  %v862_v56 = vsel %vm249_vm5, 1.0, %v1096_v17  ;;  %v848_v57 = vsel %vm179_vm6, 1.0, %v1096_v17  ;;  %v849_v58 = vsel %vm180_vm7, 1.0, %v1096_v17 }
  0xa0   : > { %vm254_vm14 = vcmp.eq.s32.totalorder %v1210_v14, %v1293_v39  ;;  %v863_v59 = vsel %vm250_vm8, 1.0, %v1096_v17  ;;  %v864_v62 = vsel %vm251_vm9, 1.0, %v1096_v17  ;;  %v865_v63 = vsel %vm252_vm10, 1.0, %v1096_v17 }
  0xa1   : > { %vm183_vm15 = vcmp.eq.s32.totalorder %v1215_v15, %v1258_v26  ;;  %v850_v1 = vsel %vm181_vm11, 1.0, %v1096_v17  ;;  %v866_v2 = vsel %vm253_vm12, 1.0, %v1096_v17  ;;  %v851_v4 = vsel %vm182_vm13, 1.0, %v1096_v17 }
  0xa2   : > { %v1418_v5 = vsel %vm254_vm14, 1.0, %v1096_v17  ;;  %v1428_v23 = vsel %vm183_vm15, 1.0, %v1096_v17  ;;  %vm255_vm12 = vcmp.eq.s32.totalorder %v1215_v15, %v1293_v39  ;;  %vm434_vm15 = vcmp.eq.s32.totalorder %v1210_v14, %v1228_v19 }
  0xa4   : > { %v1391_v0 = vpop.permute.xlu0 %211 }
  0xa5   : > { %vm217_vm0 = vcmp.eq.s32.totalorder %v1203_v13, %v1391_v0  ;;  %vm218_vm1 = vcmp.eq.s32.totalorder %v1210_v14, %v1391_v0  ;;  %vm219_vm2 = vcmp.eq.s32.totalorder %v1215_v15, %v1391_v0  ;;  %vm213_vm3 = vcmp.eq.s32.totalorder %v1187_v60, %v1391_v0 }
  0xa6   : > { %v858_v6 = vsel %vm217_vm0, 1.0, %v1096_v17  ;;  %v859_v7 = vsel %vm218_vm1, 1.0, %v1096_v17  ;;  %v1423_v10 = vsel %vm219_vm2, 1.0, %v1096_v17  ;;  %v1425_v11 = vpop.permute.xlu1 %283  ;;  %vm214_vm5 = vcmp.eq.s32.totalorder %v1192_v8, %v1391_v0 }
  0xa7   : > { %vm285_vm4 = vcmp.eq.s32.totalorder %v1187_v60, %v1425_v11  ;;  %vm286_vm6 = vcmp.eq.s32.totalorder %v1192_v8, %v1425_v11  ;;  %v854_v24 = vsel %vm213_vm3, 1.0, %v1096_v17  ;;  %v855_v29 = vsel %vm214_vm5, 1.0, %v1096_v17 }
  0xa8   : > { %v870_v28 = vsel %vm285_vm4, 1.0, %v1096_v17  ;;  %v871_v30 = vsel %vm286_vm6, 1.0, %v1096_v17  ;;  %v237_v35 = vadd.f32 %v854_v24, %v846_v52  ;;  %v238_v36 = vadd.f32 %v855_v29, %v847_v55 }
  0xa9   : > { %vm215_vm7 = vcmp.eq.s32.totalorder %v1195_v9, %v1391_v0  ;;  %vm287_vm8 = vcmp.eq.s32.totalorder %v1195_v9, %v1425_v11  ;;  %vm216_vm9 = vcmp.eq.s32.totalorder %v1200_v12, %v1391_v0  ;;  %vm288_vm10 = vcmp.eq.s32.totalorder %v1200_v12, %v1425_v11 }
  0xaa   : > { %v856_v37 = vsel %vm215_vm7, 1.0, %v1096_v17  ;;  %v872_v41 = vsel %vm287_vm8, 1.0, %v1096_v17  ;;  %v273_v42 = vadd.f32 %v862_v56, %v237_v35  ;;  %v274_v47 = vadd.f32 %v863_v59, %v238_v36 }
  0xab   : > { %v239_v48 = vadd.f32 %v856_v37, %v848_v57  ;;  %v857_v50 = vsel %vm216_vm9, 1.0, %v1096_v17  ;;  %v873_v52 = vsel %vm288_vm10, 1.0, %v1096_v17  ;;  %v241_v53 = vadd.f32 %v858_v6, %v850_v1 }
  0xac   : > { %v240_v51 = vadd.f32 %v857_v50, %v849_v58  ;;  %vm289_vm11 = vcmp.eq.s32.totalorder %v1203_v13, %v1425_v11  ;;  %vm220_vm13 = vcmp.eq.s32.totalorder %v1218_v16, %v1391_v0  ;;  %v309_v54 = vadd.f32 %v870_v28, %v273_v42 }
  0xad   : > { %v310_v55 = vadd.f32 %v871_v30, %v274_v47  ;;  %v275_v56 = vadd.f32 %v864_v62, %v239_v48  ;;  %v874_v57 = vsel %vm289_vm11, 1.0, %v1096_v17  ;;  %v277_v24 = vadd.f32 %v866_v2, %v241_v53 }
  0xae   : > { %v276_v59 = vadd.f32 %v865_v63, %v240_v51  ;;  %v242_v58 = vadd.f32 %v859_v7, %v851_v4  ;;  %vm290_vm14 = vcmp.eq.s32.totalorder %v1210_v14, %v1425_v11  ;;  %v345_v6 = vadd.f32 %v1224_v18, %v309_v54 }
  0xaf   : > { %v1463_v1 = vpop.permute.xlu1 %391  ;;  %v346_v29 = vadd.f32 %v1233_v20, %v310_v55  ;;  %v311_v35 = vadd.f32 %v872_v41, %v275_v56  ;;  %v875_v36 = vsel %vm290_vm14, 1.0, %v1096_v17  ;;  %vm184_vm0 = vcmp.eq.s32.totalorder %v1218_v16, %v1258_v26 }
  0xb0   : > { %vm393_vm1 = vcmp.eq.s32.totalorder %v1187_v60, %v1463_v1  ;;  %vm394_vm2 = vcmp.eq.s32.totalorder %v1192_v8, %v1463_v1  ;;  %vm395_vm3 = vcmp.eq.s32.totalorder %v1195_v9, %v1463_v1  ;;  %v312_v18 = vadd.f32 %v873_v52, %v276_v59 }
  0xb1   : > { %v381_v20 = vadd.f32 %v1261_v27, %v345_v6  ;;  %v894_v62 = vsel %vm393_vm1, 1.0, %v1096_v17  ;;  %v382_v63 = vadd.f32 %v1277_v32, %v346_v29  ;;  %v895_v2 = vsel %vm394_vm2, 1.0, %v1096_v17 }
  0xb2   : > { %vm327_vm4 = vcmp.eq.s32.totalorder %v1215_v15, %v1185_v38  ;;  %v347_v60 = vadd.f32 %v1236_v21, %v311_v35  ;;  %v896_v4 = vsel %vm395_vm3, 1.0, %v1096_v17  ;;  %v348_v8 = vadd.f32 %v1245_v22, %v312_v18 }
  0xb3   : > { %vm396_vm5 = vcmp.eq.s32.totalorder %v1200_v12, %v1463_v1  ;;  %v417_v9 = vadd.f32 %v894_v62, %v381_v20  ;;  %v418_v27 = vadd.f32 %v895_v2, %v382_v63  ;;  %v313_v28 = vadd.f32 %v874_v57, %v277_v24 }
  0xb4   : > { %v897_v7 = vsel %vm396_vm5, 1.0, %v1096_v17  ;;  %vm363_vm6 = vcmp.eq.s32.totalorder %v1215_v15, %v1189_v61  ;;  %v383_v32 = vadd.f32 %v1283_v33, %v347_v60  ;;  %v384_v30 = vadd.f32 %v1289_v34, %v348_v8 }
  0xb5   : > { %vm397_vm7 = vcmp.eq.s32.totalorder %v1203_v13, %v1463_v1  ;;  %v278_v21 = vadd.f32 %v1418_v5, %v242_v58  ;;  %v453_v22 = vadd.f32 %v1301_v40, %v417_v9  ;;  %v454_v12 = vadd.f32 %v1321_v45, %v418_v27 }
  0xb6   : > { %v349_v37 = vadd.f32 %v1252_v25, %v313_v28  ;;  %v898_v41 = vsel %vm397_vm7, 1.0, %v1096_v17  ;;  %v419_v42 = vadd.f32 %v896_v4, %v383_v32  ;;  %v420_v47 = vadd.f32 %v897_v7, %v384_v30 }
  0xb7   : > { %v314_v48 = vadd.f32 %v875_v36, %v278_v21  ;;  %vm398_vm8 = vcmp.eq.s32.totalorder %v1210_v14, %v1463_v1  ;;  %605 = vmatmul.f32.vlgmr.msra.gmra.mxu0 %v453_v22  ;;  %625 = vmatmul.f32.vlgmr.msra.gmra.mxu1 %v454_v12  ;;  %v243_v33 = vadd.f32 %v1423_v10, %v1428_v23  ;;  %v868_v25 = vsel %vm255_vm12, 1.0, %v1096_v17 }
  0xb8   : > { %v385_v13 = vadd.f32 %v1307_v43, %v349_v37  ;;  %vm291_vm9 = vcmp.eq.s32.totalorder %v1215_v15, %v1425_v11  ;;  %v861_v34 = vsel %vm220_vm13, 1.0, %v1096_v17  ;;  %v455_v40 = vadd.f32 %v1327_v46, %v419_v42 }
  0xb9   : > { %v456_v43 = vadd.f32 %v1341_v49, %v420_v47  ;;  %v350_v45 = vadd.f32 %v1271_v31, %v314_v48  ;;  %v899_v10 = vsel %vm398_vm8, 1.0, %v1096_v17  ;;  %v279_v23 = vadd.f32 %v868_v25, %v243_v33 }
  0xba   : > { %v421_v5 = vadd.f32 %v898_v41, %v385_v13  ;;  %vm256_vm10 = vcmp.eq.s32.totalorder %v1218_v16, %v1293_v39  ;;  %645 = vmatmul.f32.vlgmr.msra.gmra.mxu2 %v455_v40  ;;  %v907_v46 = vsel %vm434_vm15, 1.0, %v1096_v17  ;;  %v876_v49 = vsel %vm291_vm9, 1.0, %v1096_v17 }
  0xbb   : > { %665 = vmatmul.f32.vlgmr.msra.gmra.mxu3 %v456_v43  ;;  %v386_v50 = vadd.f32 %v1313_v44, %v350_v45  ;;  %v853_v31 = vsel %vm184_vm0, 1.0, %v1096_v17  ;;  %v315_v0 = vadd.f32 %v876_v49, %v279_v23  ;;  %vm399_vm11 = vcmp.eq.s32.totalorder %v1215_v15, %v1463_v1 }
  0xbc   : > { %v244_v39 = vadd.f32 %v861_v34, %v853_v31  ;;  %vm292_vm12 = vcmp.eq.s32.totalorder %v1218_v16, %v1425_v11  ;;  %v884_v14 = vsel %vm327_vm4, 1.0, %v1096_v17  ;;  %vm435_vm13 = vcmp.eq.s32.totalorder %v1215_v15, %v1228_v19 }
  0xbd   : > { %v422_v44 = vadd.f32 %v899_v10, %v386_v50  ;;  %v869_v26 = vsel %vm256_vm10, 1.0, %v1096_v17  ;;  %v457_v51 = vadd.f32 %v1405_v3, %v421_v5  ;;  %v351_v52 = vadd.f32 %v884_v14, %v315_v0 }
  0xbe   : > { %v280_v53 = vadd.f32 %v869_v26, %v244_v39  ;;  %vm328_vm14 = vcmp.eq.s32.totalorder %v1218_v16, %v1185_v38  ;;  %v892_v11 = vsel %vm363_vm6, 1.0, %v1096_v17  ;;  %v900_v55 = vsel %vm399_vm11, 1.0, %v1096_v17 }
  0xbf   : > { %v458_v54 = vadd.f32 %v907_v46, %v422_v44  ;;  %v877_v56 = vsel %vm292_vm12, 1.0, %v1096_v17  ;;  %685 = vmatmul.f32.vlgmr.msrb.gmra.mxu0 %v457_v51  ;;  %v387_v57 = vadd.f32 %v892_v11, %v351_v52  ;;  %vm364_vm15 = vcmp.eq.s32.totalorder %v1218_v16, %v1189_v61 }
  0xc0   : > { %v316_v59 = vadd.f32 %v877_v56, %v280_v53  ;;  %vm400_vm0 = vcmp.eq.s32.totalorder %v1218_v16, %v1463_v1  ;;  %v908_v38 = vsel %vm435_vm13, 1.0, %v1096_v17  ;;  %v885_v3 = vsel %vm328_vm14, 1.0, %v1096_v17 }
  0xc1   : > { %705 = vmatmul.f32.vlgmr.msrb.gmra.mxu1 %v458_v54  ;;  %v423_v24 = vadd.f32 %v900_v55, %v387_v57  ;;  %vm436_vm1 = vcmp.eq.s32.totalorder %v1218_v16, %v1228_v19  ;;  %v893_v6 = vsel %vm364_vm15, 1.0, %v1096_v17  ;;  %v901_v61 = vsel %vm400_vm0, 1.0, %v1096_v17 }
  0xc2   : > { %v352_v58 = vadd.f32 %v885_v3, %v316_v59  ;;  %v909_v35 = vsel %vm436_vm1, 1.0, %v1096_v17 }
  0xc3   : > { %v459_v29 = vadd.f32 %v908_v38, %v423_v24 }
  0xc4   : > { %v388_v1 = vadd.f32 %v893_v6, %v352_v58 }
  0xc5   : > { %725 = vmatmul.f32.vlgmr.msrb.gmra.mxu2 %v459_v29 }
  0xc6   : > { %v424_v15 = vadd.f32 %v901_v61, %v388_v1 }
  0xc8   : > { %v460_v36 = vadd.f32 %v909_v35, %v424_v15 }
  0xca   : > { %745 = vmatmul.f32.vlgmr.msrb.gmra.mxu3 %v460_v36 }
 0x134   : > { %v606_v18 = vpop.f32.mrf.mxu0  ;;  %v626_v20 = vpop.f32.mrf.mxu1 }
 0x135   : > { %v627_v62 = vadd.f32 %v626_v20, %v606_v18 }
 0x13c   : > { %v686_v60 = vpop.f32.mrf.mxu0 }
 0x13d   : > { %v646_v63 = vpop.f32.mrf.mxu2 }
 0x13e   : > { %v647_v2 = vadd.f32 %v646_v63, %v627_v62  ;;  %v666_v16 = vpop.f32.mrf.mxu3  ;;  %v706_v8 = vpop.f32.mrf.mxu1 }
 0x140   : > { %v667_v19 = vadd.f32 %v666_v16, %v647_v2 }
 0x142   : > { %v687_v4 = vadd.f32 %v686_v60, %v667_v19 }
 0x144   : > { %v707_v9 = vadd.f32 %v706_v8, %v687_v4 }
 0x148   : > { %v726_v17 = vpop.f32.mrf.mxu2 }
 0x149   : > { %v727_v27 = vadd.f32 %v726_v17, %v707_v9 }
 0x14d   : > { %v746_v7 = vpop.f32.mrf.mxu3 }
 0x14e   : > { %v747_v28 = vadd.f32 %v746_v7, %v727_v27 }
 0x150   : > { %749 = vst [vmem:[%s151_s17] sm:$0xff] %v747_v28 }
 0x151   : > { %1044 = shalt.err (!%p1041_p8)
}
 0x152   : > { %921 = dma.vmem_to_hbm [thread:$0]  (%p1150_p5), %s764_s21, 128, %s766_s22, %s751_s23  }
 0x153 PF: > { %p933_p9 = scmp.ge.s32.totalorder %s1083_s12, 2  ;;  %s777_s30 = sand.u32 1, %s1071_s9  }
 0x154   : > { %s778_s3 = scalar_lea.sflag [#allocation4], %s777_s30 }
 0x155   : > { %p928_p10 = pnand %p933_p9, %p1154_p6 }
 0x157   : > { %p929_p11 = pneg %p928_p10 }
 0x159   : > { %1066 = dma.done.wait (%p929_p11), %s778_s3, 128  }
 0x15a   : > { %1068 = vsyncadd (%p929_p11), %s778_s3, 4294967168  ;;  %p13_p12 = scmp.ge.s32.totalorder %s1137_s15, 4   ;;  %s1603_s9 = smov %s1075_s10 }
 0x15b   : > { %s1604_s10 = smov %s1079_s11  ;;  %s1605_s11 = smov %s1148_s18 }
 0x15c   : > { %s1606_s12 = smov %s1137_s15  ;;  %15 = sbr.rel (!%p13_p12) target bundleno = 4 (0x4), region = 68 }
 0x161   :  { %784 = vsyncpa [#allocation3], 1 }
 0x162   :  { %786 = vsyncpa [#allocation3 + $0x1], 1 }
 0x163   :  { %787 = vsyncpa [#allocation4], 1 }
 0x164   :  { %789 = vsyncpa [#allocation4 + $0x1], 1 }

</bundles_post_ra>
